<compile_context>
chip_gen: v5e
topology: v5e:2x2
jax: 0.10.0
libtpu: 0.0.40
codegen_flags: <defaults>
</compile_context>

<pallas_src>
import numpy as np
import jax
import jax.numpy as jnp
from jax.experimental import pallas as pl
from jax.experimental.pallas import tpu as pltpu


# ---------------------------------------------------------------------------
# Deterministic parameter setup (mirrors build_gauss_kernel exactly, in numpy).
# Used only by the pure-JAX reference; the Pallas path bakes the taps into the
# host-built operator matrices below.
# ---------------------------------------------------------------------------
def build_gauss_kernel(size=5, sigma=1.0, n_channels=3):
    if size % 2 != 1:
        raise ValueError("kernel size must be uneven")
    grid = np.float32(np.mgrid[0:size, 0:size].T)
    gaussian = lambda x: np.exp((x - size // 2) ** 2 / (-2 * sigma ** 2)) ** 2
    kernel = np.sum(gaussian(grid), axis=2)
    kernel /= np.sum(kernel)
    kernel = np.tile(kernel, (n_channels, 1, 1, 1))  # (C, 1, k, k)
    return kernel.astype(np.float32)


# ---------------------------------------------------------------------------
# Host-side constant operator matrices (one dense, de-kroned set per level).
#
# The 5x5 replicate-padded kernel of the reference is rank-2
# (k[i,j] = (g(i)+g(j))/S), so blur + 2x2 avg-pool collapse into
#     nxt = L1 @ cur @ R1 + L2 @ cur @ R2
# with clamped-Toeplitz band matrices folded with the pooling matrices, and the
# nearest 2x upsample is up = UL @ nxt @ UR with 0/1 selection matrices.
# Per level we ship:
#     Lstk (h, h)   = concat([L1, L2], axis=0)
#     R1   (w, w/2), R2 (w, w/2), UL (h, h/2), UR (w/2, w)
# ---------------------------------------------------------------------------
def _build_level_constants(H, W, max_level, size=5, sigma=1.0):
    K, P = size, size // 2
    g = np.exp((np.arange(K, dtype=np.float64) - P) ** 2 / (-2.0 * sigma ** 2)) ** 2
    S = 2.0 * K * g.sum()          # sum of the 2-D kernel (g(i)+g(j) over i,j)

    def conv_mats(n):
        G = np.zeros((n, n), np.float64)   # gaussian-weighted clamped band
        U = np.zeros((n, n), np.float64)   # uniform clamped band
        for y in range(n):
            for i in range(K):
                yp = min(max(y + i - P, 0), n - 1)
                G[y, yp] += g[i]
                U[y, yp] += 1.0
        return G, U

    def pool_mat(n):                       # (n//2, n), two-hot rows
        M = np.zeros((n // 2, n), np.float64)
        for p in range(n // 2):
            M[p, 2 * p] = 1.0
            M[p, 2 * p + 1] = 1.0
        return M

    def up_mat(n):                         # (n, n//2): M[y, p] = [p == y // 2]
        M = np.zeros((n, n // 2), np.float64)
        for y in range(n):
            M[y, y // 2] = 1.0
        return M

    consts, level_shapes = [], []
    h, w = H, W
    for _ in range(max_level):
        Gv, Uv = conv_mats(h)
        Gh, Uh = conv_mats(w)
        Ph, Pw = pool_mat(h), pool_mat(w)
        L1 = (0.25 / S) * (Ph @ Gv)                 # (h/2, h)   gaussian vertical
        L2 = (0.25 / S) * (Ph @ Uv)                 # (h/2, h)   uniform vertical
        Lstk = np.concatenate([L1, L2], axis=0)     # (h, h)
        R1 = (Pw @ Uh).T                            # (w, w/2)   uniform horizontal
        R2 = (Pw @ Gh).T                            # (w, w/2)   gaussian horizontal
        UL = up_mat(h)                              # (h, h/2)
        UR = up_mat(w).T                            # (w/2, w)
        consts += [Lstk, R1, R2, UL, UR]
        level_shapes.append((h, w))
        h //= 2
        w //= 2
    consts = [jnp.asarray(m.astype(np.float32)) for m in consts]
    return consts, level_shapes


def _padded_bytes(shape, itemsize=4):
    """Bytes of a VMEM buffer with last two dims padded to the (8, 128) tile."""
    shape = tuple(int(s) for s in shape)
    lead = int(np.prod(shape[:-2])) if len(shape) > 2 else 1
    r, c = shape[-2], shape[-1]
    return lead * (-(-r // 8) * 8) * (-(-c // 128) * 128) * itemsize


# ---------------------------------------------------------------------------
# Fused Pallas kernel: one program = one (batch, channel) image, all levels
# kept in VMEM (the intermediate pyramid images never touch HBM).
# ---------------------------------------------------------------------------
def _make_pyramid_kernel(max_level, level_shapes):
    n_const = 5 * max_level

    def kernel(*refs):
        x_ref = refs[0]
        const_refs = refs[1:1 + n_const]
        out_refs = refs[1 + n_const:]

        cur = x_ref[0]                                   # (H, W) f32
        for lvl in range(max_level):
            h, _ = level_shapes[lvl]
            Lstk, R1, R2, UL, UR = (r[...] for r in
                                    const_refs[5 * lvl: 5 * lvl + 5])
            # vertical blur+pool for both tap sets in ONE matmul
            T = jnp.dot(Lstk, cur, preferred_element_type=jnp.float32)   # (h, w)
            # horizontal blur+pool (dense, de-kroned right operators)
            nxt = (jnp.dot(T[: h // 2], R1, preferred_element_type=jnp.float32)
                   + jnp.dot(T[h // 2:], R2, preferred_element_type=jnp.float32))
            # nearest-neighbor 2x upsample (small dense 0/1 matmuls)
            up = jnp.dot(UL,
                         jnp.dot(nxt, UR, preferred_element_type=jnp.float32),
                         preferred_element_type=jnp.float32)             # (h, w)
            out_refs[lvl][0] = cur - up
            cur = nxt

    return kernel


def laplacian_pyramid(x, max_level=5):
    """Pallas version of LaplacianPyramid.forward; returns the list of diffs."""
    x = x.astype(jnp.float32)
    B, C, H, W = x.shape
    assert H % (1 << max_level) == 0 and W % (1 << max_level) == 0, (
        "H and W must be divisible by 2**max_level")

    consts, level_shapes = _build_level_constants(H, W, max_level)

    # Channels become extra (independent) grid steps: (B, C, H, W) -> (B*C, H, W)
    N = B * C
    x_flat = x.reshape(N, H, W)

    in_specs = [pl.BlockSpec((1, H, W), lambda n: (n, 0, 0))]
    in_specs += [pl.BlockSpec(m.shape, lambda n: (0, 0)) for m in consts]

    out_specs = tuple(
        pl.BlockSpec((1, h, w), lambda n: (n, 0, 0)) for (h, w) in level_shapes)
    out_shape = tuple(
        jax.ShapeDtypeStruct((N, h, w), jnp.float32) for (h, w) in level_shapes)

    # --- explicit VMEM budget (double-buffered I/O + constants + live values) ---
    vmem_est = 2 * _padded_bytes((1, H, W))
    vmem_est += sum(2 * _padded_bytes(m.shape) for m in consts)
    vmem_est += sum(2 * _padded_bytes((1, h, w)) for (h, w) in level_shapes)
    vmem_est += 6 * _padded_bytes((H, W))          # cur / T / nxt / up live values
    assert vmem_est <= 48 * 2 ** 20, (
        f"Working set ~{vmem_est / 2**20:.1f} MiB exceeds the per-core VMEM "
        "budget (v7x has 64 MiB); tile level-0 rows before calling.")
    vmem_limit = int(min(max(2 * vmem_est, 32 * 2 ** 20), 96 * 2 ** 20))

    diffs_flat = pl.pallas_call(
        _make_pyramid_kernel(max_level, level_shapes),
        grid=(N,),
        in_specs=in_specs,
        out_specs=out_specs,
        out_shape=out_shape,
        compiler_params=pltpu.CompilerParams(
            dimension_semantics=("parallel",),      # B*C steps across TCs on v7x
            vmem_limit_bytes=vmem_limit),
    )(x_flat, *consts)

    # (B*C, h, w) -> (B, C, h, w)   (contiguous reshape, free in XLA)
    return [d.reshape(B, C, h, w) for d, (h, w) in zip(diffs_flat, level_shapes)]


# ---------------------------------------------------------------------------
# Pure-JAX reference (mirrors the PyTorch module) for a correctness check.
# ---------------------------------------------------------------------------
def _reference_pyramid(x, max_level=5):
    B, C, H, W = x.shape
    gk = build_gauss_kernel(size=5, sigma=1.0, n_channels=C)        # (C,1,5,5)
    w = jnp.asarray(gk)                                             # depthwise
    P = gk.shape[-1] // 2
    pyr, cur = [], x
    for _ in range(max_level):
        b, _, h, ww = cur.shape
        xp = jnp.pad(cur, ((0, 0), (0, 0), (P, P), (P, P)), mode="edge")
        blurred = jax.lax.conv_general_dilated(
            xp, w, (1, 1), "VALID",
            dimension_numbers=("NCHW", "OIHW", "NCHW"),
            feature_group_count=C,
            precision=jax.lax.Precision.HIGHEST)
        nxt = blurred.reshape(b, C, h // 2, 2, ww // 2, 2).mean(axis=(3, 5))
        up = jnp.repeat(jnp.repeat(nxt, 2, axis=2), 2, axis=3)
        pyr.append(cur - up)
        cur = nxt
    return pyr


if __name__ == "__main__":
    max_level = 5
    B, C, H, W = 2, 3, 32, 32          # module hardcodes n_channels=3

    key = jax.random.PRNGKey(0)
    x = jax.random.normal(key, (B, C, H, W), dtype=jnp.float32)

    pyr = laplacian_pyramid(x, max_level=max_level)
    for p in pyr:
        jax.block_until_ready(p)

    ref = _reference_pyramid(x, max_level=max_level)
    for got, want in zip(pyr, ref):
        np.testing.assert_allclose(np.asarray(got), np.asarray(want),
                                   rtol=1e-3, atol=1e-3)

    print("KERNEL_OK")
</pallas_src>

<mosaic_0001>
module attributes {stable_mosaic.version = 11 : i64} {
  func.func @kernel(%arg0: i32, %arg1: memref<1x32x32xf32, #tpu.memory_space<vmem>>, %arg2: memref<32x32xf32, #tpu.memory_space<vmem>>, %arg3: memref<32x16xf32, #tpu.memory_space<vmem>>, %arg4: memref<32x16xf32, #tpu.memory_space<vmem>>, %arg5: memref<32x16xf32, #tpu.memory_space<vmem>>, %arg6: memref<16x32xf32, #tpu.memory_space<vmem>>, %arg7: memref<16x16xf32, #tpu.memory_space<vmem>>, %arg8: memref<16x8xf32, #tpu.memory_space<vmem>>, %arg9: memref<16x8xf32, #tpu.memory_space<vmem>>, %arg10: memref<16x8xf32, #tpu.memory_space<vmem>>, %arg11: memref<8x16xf32, #tpu.memory_space<vmem>>, %arg12: memref<8x8xf32, #tpu.memory_space<vmem>>, %arg13: memref<8x4xf32, #tpu.memory_space<vmem>>, %arg14: memref<8x4xf32, #tpu.memory_space<vmem>>, %arg15: memref<8x4xf32, #tpu.memory_space<vmem>>, %arg16: memref<4x8xf32, #tpu.memory_space<vmem>>, %arg17: memref<4x4xf32, #tpu.memory_space<vmem>>, %arg18: memref<4x2xf32, #tpu.memory_space<vmem>>, %arg19: memref<4x2xf32, #tpu.memory_space<vmem>>, %arg20: memref<4x2xf32, #tpu.memory_space<vmem>>, %arg21: memref<2x4xf32, #tpu.memory_space<vmem>>, %arg22: memref<2x2xf32, #tpu.memory_space<vmem>>, %arg23: memref<2x1xf32, #tpu.memory_space<vmem>>, %arg24: memref<2x1xf32, #tpu.memory_space<vmem>>, %arg25: memref<2x1xf32, #tpu.memory_space<vmem>>, %arg26: memref<1x2xf32, #tpu.memory_space<vmem>>, %arg27: memref<1x32x32xf32, #tpu.memory_space<vmem>>, %arg28: memref<1x16x16xf32, #tpu.memory_space<vmem>>, %arg29: memref<1x8x8xf32, #tpu.memory_space<vmem>>, %arg30: memref<1x4x4xf32, #tpu.memory_space<vmem>>, %arg31: memref<1x2x2xf32, #tpu.memory_space<vmem>>) attributes {dimension_semantics = [#tpu.dimension_semantics<parallel>], iteration_bounds = array<i64: 6>, scalar_prefetch = 0 : i64, scratch_operands = 0 : i64, tpu.core_type = #tpu.core_type<tc>, window_params = [{transform_indices = @transform_0, window_bounds = array<i64: 1, 32, 32>}, {pipeline_mode = #tpu.pipeline_mode<synchronous>, transform_indices = @transform_1, window_bounds = array<i64: 32, 32>}, {pipeline_mode = #tpu.pipeline_mode<synchronous>, transform_indices = @transform_2, window_bounds = array<i64: 32, 16>}, {pipeline_mode = #tpu.pipeline_mode<synchronous>, transform_indices = @transform_3, window_bounds = array<i64: 32, 16>}, {pipeline_mode = #tpu.pipeline_mode<synchronous>, transform_indices = @transform_4, window_bounds = array<i64: 32, 16>}, {pipeline_mode = #tpu.pipeline_mode<synchronous>, transform_indices = @transform_5, window_bounds = array<i64: 16, 32>}, {pipeline_mode = #tpu.pipeline_mode<synchronous>, transform_indices = @transform_6, window_bounds = array<i64: 16, 16>}, {pipeline_mode = #tpu.pipeline_mode<synchronous>, transform_indices = @transform_7, window_bounds = array<i64: 16, 8>}, {pipeline_mode = #tpu.pipeline_mode<synchronous>, transform_indices = @transform_8, window_bounds = array<i64: 16, 8>}, {pipeline_mode = #tpu.pipeline_mode<synchronous>, transform_indices = @transform_9, window_bounds = array<i64: 16, 8>}, {pipeline_mode = #tpu.pipeline_mode<synchronous>, transform_indices = @transform_10, window_bounds = array<i64: 8, 16>}, {pipeline_mode = #tpu.pipeline_mode<synchronous>, transform_indices = @transform_11, window_bounds = array<i64: 8, 8>}, {pipeline_mode = #tpu.pipeline_mode<synchronous>, transform_indices = @transform_12, window_bounds = array<i64: 8, 4>}, {pipeline_mode = #tpu.pipeline_mode<synchronous>, transform_indices = @transform_13, window_bounds = array<i64: 8, 4>}, {pipeline_mode = #tpu.pipeline_mode<synchronous>, transform_indices = @transform_14, window_bounds = array<i64: 8, 4>}, {pipeline_mode = #tpu.pipeline_mode<synchronous>, transform_indices = @transform_15, window_bounds = array<i64: 4, 8>}, {pipeline_mode = #tpu.pipeline_mode<synchronous>, transform_indices = @transform_16, window_bounds = array<i64: 4, 4>}, {pipeline_mode = #tpu.pipeline_mode<synchronous>, transform_indices = @transform_17, window_bounds = array<i64: 4, 2>}, {pipeline_mode = #tpu.pipeline_mode<synchronous>, transform_indices = @transform_18, window_bounds = array<i64: 4, 2>}, {pipeline_mode = #tpu.pipeline_mode<synchronous>, transform_indices = @transform_19, window_bounds = array<i64: 4, 2>}, {pipeline_mode = #tpu.pipeline_mode<synchronous>, transform_indices = @transform_20, window_bounds = array<i64: 2, 4>}, {pipeline_mode = #tpu.pipeline_mode<synchronous>, transform_indices = @transform_21, window_bounds = array<i64: 2, 2>}, {pipeline_mode = #tpu.pipeline_mode<synchronous>, transform_indices = @transform_22, window_bounds = array<i64: 2, 1>}, {pipeline_mode = #tpu.pipeline_mode<synchronous>, transform_indices = @transform_23, window_bounds = array<i64: 2, 1>}, {pipeline_mode = #tpu.pipeline_mode<synchronous>, transform_indices = @transform_24, window_bounds = array<i64: 2, 1>}, {pipeline_mode = #tpu.pipeline_mode<synchronous>, transform_indices = @transform_25, window_bounds = array<i64: 1, 2>}, {transform_indices = @transform_26, window_bounds = array<i64: 1, 32, 32>}, {transform_indices = @transform_27, window_bounds = array<i64: 1, 16, 16>}, {transform_indices = @transform_28, window_bounds = array<i64: 1, 8, 8>}, {transform_indices = @transform_29, window_bounds = array<i64: 1, 4, 4>}, {transform_indices = @transform_30, window_bounds = array<i64: 1, 2, 2>}]} {
    %c0 = arith.constant 0 : index
    %c0_0 = arith.constant 0 : index
    %c0_1 = arith.constant 0 : index
    %0 = vector.load %arg1[%c0, %c0_0, %c0_1] : memref<1x32x32xf32, #tpu.memory_space<vmem>>, vector<1x32x32xf32>
    %1 = vector.shape_cast %0 : vector<1x32x32xf32> to vector<32x32xf32>
    %c0_2 = arith.constant 0 : index
    %c0_3 = arith.constant 0 : index
    %2 = vector.load %arg2[%c0_2, %c0_3] : memref<32x32xf32, #tpu.memory_space<vmem>>, vector<32x32xf32>
    %c0_4 = arith.constant 0 : index
    %c0_5 = arith.constant 0 : index
    %3 = vector.load %arg3[%c0_4, %c0_5] : memref<32x16xf32, #tpu.memory_space<vmem>>, vector<32x16xf32>
    %c0_6 = arith.constant 0 : index
    %c0_7 = arith.constant 0 : index
    %4 = vector.load %arg4[%c0_6, %c0_7] : memref<32x16xf32, #tpu.memory_space<vmem>>, vector<32x16xf32>
    %c0_8 = arith.constant 0 : index
    %c0_9 = arith.constant 0 : index
    %5 = vector.load %arg5[%c0_8, %c0_9] : memref<32x16xf32, #tpu.memory_space<vmem>>, vector<32x16xf32>
    %c0_10 = arith.constant 0 : index
    %c0_11 = arith.constant 0 : index
    %6 = vector.load %arg6[%c0_10, %c0_11] : memref<16x32xf32, #tpu.memory_space<vmem>>, vector<16x32xf32>
    %cst = arith.constant dense<0.000000e+00> : vector<32x32xf32>
    %7 = tpu.matmul %2, %1, %cst {dimension_numbers = #tpu.dot_dimension_numbers<[1], [0], [0], [1], [0, 0, 1, 1], [], []>} : vector<32x32xf32>, vector<32x32xf32>, vector<32x32xf32> -> vector<32x32xf32>
    %8 = vector.extract_strided_slice %7 {offsets = [0, 0], sizes = [16, 32], strides = [1, 1]} : vector<32x32xf32> to vector<16x32xf32>
    %cst_12 = arith.constant dense<0.000000e+00> : vector<16x16xf32>
    %9 = tpu.matmul %8, %3, %cst_12 {dimension_numbers = #tpu.dot_dimension_numbers<[1], [0], [0], [1], [0, 0, 1, 1], [], []>} : vector<16x32xf32>, vector<32x16xf32>, vector<16x16xf32> -> vector<16x16xf32>
    %10 = vector.extract_strided_slice %7 {offsets = [16, 0], sizes = [16, 32], strides = [1, 1]} : vector<32x32xf32> to vector<16x32xf32>
    %cst_13 = arith.constant dense<0.000000e+00> : vector<16x16xf32>
    %11 = tpu.matmul %10, %4, %cst_13 {dimension_numbers = #tpu.dot_dimension_numbers<[1], [0], [0], [1], [0, 0, 1, 1], [], []>} : vector<16x32xf32>, vector<32x16xf32>, vector<16x16xf32> -> vector<16x16xf32>
    %12 = arith.addf %9, %11 : vector<16x16xf32>
    %cst_14 = arith.constant dense<0.000000e+00> : vector<16x32xf32>
    %13 = tpu.matmul %12, %6, %cst_14 {dimension_numbers = #tpu.dot_dimension_numbers<[1], [0], [0], [1], [0, 0, 1, 1], [], []>} : vector<16x16xf32>, vector<16x32xf32>, vector<16x32xf32> -> vector<16x32xf32>
    %cst_15 = arith.constant dense<0.000000e+00> : vector<32x32xf32>
    %14 = tpu.matmul %5, %13, %cst_15 {dimension_numbers = #tpu.dot_dimension_numbers<[1], [0], [0], [1], [0, 0, 1, 1], [], []>} : vector<32x16xf32>, vector<16x32xf32>, vector<32x32xf32> -> vector<32x32xf32>
    %15 = arith.subf %1, %14 : vector<32x32xf32>
    %c0_16 = arith.constant 0 : index
    %c0_17 = arith.constant 0 : index
    %c0_18 = arith.constant 0 : index
    %16 = vector.load %arg27[%c0_16, %c0_17, %c0_18] : memref<1x32x32xf32, #tpu.memory_space<vmem>>, vector<1x32x32xf32>
    %17 = vector.shape_cast %16 : vector<1x32x32xf32> to vector<32x32xf32>
    %18 = vector.shape_cast %15 : vector<32x32xf32> to vector<1x32x32xf32>
    tpu.vector_store %arg27[%c0_16, %c0_17, %c0_18], %18 {strides = array<i32>} : memref<1x32x32xf32, #tpu.memory_space<vmem>>, vector<1x32x32xf32>,
    %c0_19 = arith.constant 0 : index
    %c0_20 = arith.constant 0 : index
    %19 = vector.load %arg7[%c0_19, %c0_20] : memref<16x16xf32, #tpu.memory_space<vmem>>, vector<16x16xf32>
    %c0_21 = arith.constant 0 : index
    %c0_22 = arith.constant 0 : index
    %20 = vector.load %arg8[%c0_21, %c0_22] : memref<16x8xf32, #tpu.memory_space<vmem>>, vector<16x8xf32>
    %c0_23 = arith.constant 0 : index
    %c0_24 = arith.constant 0 : index
    %21 = vector.load %arg9[%c0_23, %c0_24] : memref<16x8xf32, #tpu.memory_space<vmem>>, vector<16x8xf32>
    %c0_25 = arith.constant 0 : index
    %c0_26 = arith.constant 0 : index
    %22 = vector.load %arg10[%c0_25, %c0_26] : memref<16x8xf32, #tpu.memory_space<vmem>>, vector<16x8xf32>
    %c0_27 = arith.constant 0 : index
    %c0_28 = arith.constant 0 : index
    %23 = vector.load %arg11[%c0_27, %c0_28] : memref<8x16xf32, #tpu.memory_space<vmem>>, vector<8x16xf32>
    %cst_29 = arith.constant dense<0.000000e+00> : vector<16x16xf32>
    %24 = tpu.matmul %19, %12, %cst_29 {dimension_numbers = #tpu.dot_dimension_numbers<[1], [0], [0], [1], [0, 0, 1, 1], [], []>} : vector<16x16xf32>, vector<16x16xf32>, vector<16x16xf32> -> vector<16x16xf32>
    %25 = vector.extract_strided_slice %24 {offsets = [0, 0], sizes = [8, 16], strides = [1, 1]} : vector<16x16xf32> to vector<8x16xf32>
    %cst_30 = arith.constant dense<0.000000e+00> : vector<8x8xf32>
    %26 = tpu.matmul %25, %20, %cst_30 {dimension_numbers = #tpu.dot_dimension_numbers<[1], [0], [0], [1], [0, 0, 1, 1], [], []>} : vector<8x16xf32>, vector<16x8xf32>, vector<8x8xf32> -> vector<8x8xf32>
    %27 = vector.extract_strided_slice %24 {offsets = [8, 0], sizes = [8, 16], strides = [1, 1]} : vector<16x16xf32> to vector<8x16xf32>
    %cst_31 = arith.constant dense<0.000000e+00> : vector<8x8xf32>
    %28 = tpu.matmul %27, %21, %cst_31 {dimension_numbers = #tpu.dot_dimension_numbers<[1], [0], [0], [1], [0, 0, 1, 1], [], []>} : vector<8x16xf32>, vector<16x8xf32>, vector<8x8xf32> -> vector<8x8xf32>
    %29 = arith.addf %26, %28 : vector<8x8xf32>
    %cst_32 = arith.constant dense<0.000000e+00> : vector<8x16xf32>
    %30 = tpu.matmul %29, %23, %cst_32 {dimension_numbers = #tpu.dot_dimension_numbers<[1], [0], [0], [1], [0, 0, 1, 1], [], []>} : vector<8x8xf32>, vector<8x16xf32>, vector<8x16xf32> -> vector<8x16xf32>
    %cst_33 = arith.constant dense<0.000000e+00> : vector<16x16xf32>
    %31 = tpu.matmul %22, %30, %cst_33 {dimension_numbers = #tpu.dot_dimension_numbers<[1], [0], [0], [1], [0, 0, 1, 1], [], []>} : vector<16x8xf32>, vector<8x16xf32>, vector<16x16xf32> -> vector<16x16xf32>
    %32 = arith.subf %12, %31 : vector<16x16xf32>
    %c0_34 = arith.constant 0 : index
    %c0_35 = arith.constant 0 : index
    %c0_36 = arith.constant 0 : index
    %33 = vector.load %arg28[%c0_34, %c0_35, %c0_36] : memref<1x16x16xf32, #tpu.memory_space<vmem>>, vector<1x16x16xf32>
    %34 = vector.shape_cast %33 : vector<1x16x16xf32> to vector<16x16xf32>
    %35 = vector.shape_cast %32 : vector<16x16xf32> to vector<1x16x16xf32>
    tpu.vector_store %arg28[%c0_34, %c0_35, %c0_36], %35 {strides = array<i32>} : memref<1x16x16xf32, #tpu.memory_space<vmem>>, vector<1x16x16xf32>,
    %c0_37 = arith.constant 0 : index
    %c0_38 = arith.constant 0 : index
    %36 = vector.load %arg12[%c0_37, %c0_38] : memref<8x8xf32, #tpu.memory_space<vmem>>, vector<8x8xf32>
    %c0_39 = arith.constant 0 : index
    %c0_40 = arith.constant 0 : index
    %37 = vector.load %arg13[%c0_39, %c0_40] : memref<8x4xf32, #tpu.memory_space<vmem>>, vector<8x4xf32>
    %c0_41 = arith.constant 0 : index
    %c0_42 = arith.constant 0 : index
    %38 = vector.load %arg14[%c0_41, %c0_42] : memref<8x4xf32, #tpu.memory_space<vmem>>, vector<8x4xf32>
    %c0_43 = arith.constant 0 : index
    %c0_44 = arith.constant 0 : index
    %39 = vector.load %arg15[%c0_43, %c0_44] : memref<8x4xf32, #tpu.memory_space<vmem>>, vector<8x4xf32>
    %c0_45 = arith.constant 0 : index
    %c0_46 = arith.constant 0 : index
    %40 = vector.load %arg16[%c0_45, %c0_46] : memref<4x8xf32, #tpu.memory_space<vmem>>, vector<4x8xf32>
    %cst_47 = arith.constant dense<0.000000e+00> : vector<8x8xf32>
    %41 = tpu.matmul %36, %29, %cst_47 {dimension_numbers = #tpu.dot_dimension_numbers<[1], [0], [0], [1], [0, 0, 1, 1], [], []>} : vector<8x8xf32>, vector<8x8xf32>, vector<8x8xf32> -> vector<8x8xf32>
    %42 = vector.extract_strided_slice %41 {offsets = [0, 0], sizes = [4, 8], strides = [1, 1]} : vector<8x8xf32> to vector<4x8xf32>
    %cst_48 = arith.constant dense<0.000000e+00> : vector<4x4xf32>
    %43 = tpu.matmul %42, %37, %cst_48 {dimension_numbers = #tpu.dot_dimension_numbers<[1], [0], [0], [1], [0, 0, 1, 1], [], []>} : vector<4x8xf32>, vector<8x4xf32>, vector<4x4xf32> -> vector<4x4xf32>
    %44 = vector.extract_strided_slice %41 {offsets = [4, 0], sizes = [4, 8], strides = [1, 1]} : vector<8x8xf32> to vector<4x8xf32>
    %cst_49 = arith.constant dense<0.000000e+00> : vector<4x4xf32>
    %45 = tpu.matmul %44, %38, %cst_49 {dimension_numbers = #tpu.dot_dimension_numbers<[1], [0], [0], [1], [0, 0, 1, 1], [], []>} : vector<4x8xf32>, vector<8x4xf32>, vector<4x4xf32> -> vector<4x4xf32>
    %46 = arith.addf %43, %45 : vector<4x4xf32>
    %cst_50 = arith.constant dense<0.000000e+00> : vector<4x8xf32>
    %47 = tpu.matmul %46, %40, %cst_50 {dimension_numbers = #tpu.dot_dimension_numbers<[1], [0], [0], [1], [0, 0, 1, 1], [], []>} : vector<4x4xf32>, vector<4x8xf32>, vector<4x8xf32> -> vector<4x8xf32>
    %cst_51 = arith.constant dense<0.000000e+00> : vector<8x8xf32>
    %48 = tpu.matmul %39, %47, %cst_51 {dimension_numbers = #tpu.dot_dimension_numbers<[1], [0], [0], [1], [0, 0, 1, 1], [], []>} : vector<8x4xf32>, vector<4x8xf32>, vector<8x8xf32> -> vector<8x8xf32>
    %49 = arith.subf %29, %48 : vector<8x8xf32>
    %c0_52 = arith.constant 0 : index
    %c0_53 = arith.constant 0 : index
    %c0_54 = arith.constant 0 : index
    %50 = vector.load %arg29[%c0_52, %c0_53, %c0_54] : memref<1x8x8xf32, #tpu.memory_space<vmem>>, vector<1x8x8xf32>
    %51 = vector.shape_cast %50 : vector<1x8x8xf32> to vector<8x8xf32>
    %52 = vector.shape_cast %49 : vector<8x8xf32> to vector<1x8x8xf32>
    tpu.vector_store %arg29[%c0_52, %c0_53, %c0_54], %52 {strides = array<i32>} : memref<1x8x8xf32, #tpu.memory_space<vmem>>, vector<1x8x8xf32>,
    %c0_55 = arith.constant 0 : index
    %c0_56 = arith.constant 0 : index
    %53 = vector.load %arg17[%c0_55, %c0_56] : memref<4x4xf32, #tpu.memory_space<vmem>>, vector<4x4xf32>
    %c0_57 = arith.constant 0 : index
    %c0_58 = arith.constant 0 : index
    %54 = vector.load %arg18[%c0_57, %c0_58] : memref<4x2xf32, #tpu.memory_space<vmem>>, vector<4x2xf32>
    %c0_59 = arith.constant 0 : index
    %c0_60 = arith.constant 0 : index
    %55 = vector.load %arg19[%c0_59, %c0_60] : memref<4x2xf32, #tpu.memory_space<vmem>>, vector<4x2xf32>
    %c0_61 = arith.constant 0 : index
    %c0_62 = arith.constant 0 : index
    %56 = vector.load %arg20[%c0_61, %c0_62] : memref<4x2xf32, #tpu.memory_space<vmem>>, vector<4x2xf32>
    %c0_63 = arith.constant 0 : index
    %c0_64 = arith.constant 0 : index
    %57 = vector.load %arg21[%c0_63, %c0_64] : memref<2x4xf32, #tpu.memory_space<vmem>>, vector<2x4xf32>
    %cst_65 = arith.constant dense<0.000000e+00> : vector<4x4xf32>
    %58 = tpu.matmul %53, %46, %cst_65 {dimension_numbers = #tpu.dot_dimension_numbers<[1], [0], [0], [1], [0, 0, 1, 1], [], []>} : vector<4x4xf32>, vector<4x4xf32>, vector<4x4xf32> -> vector<4x4xf32>
    %59 = vector.extract_strided_slice %58 {offsets = [0, 0], sizes = [2, 4], strides = [1, 1]} : vector<4x4xf32> to vector<2x4xf32>
    %cst_66 = arith.constant dense<0.000000e+00> : vector<2x2xf32>
    %60 = tpu.matmul %59, %54, %cst_66 {dimension_numbers = #tpu.dot_dimension_numbers<[1], [0], [0], [1], [0, 0, 1, 1], [], []>} : vector<2x4xf32>, vector<4x2xf32>, vector<2x2xf32> -> vector<2x2xf32>
    %61 = vector.extract_strided_slice %58 {offsets = [2, 0], sizes = [2, 4], strides = [1, 1]} : vector<4x4xf32> to vector<2x4xf32>
    %cst_67 = arith.constant dense<0.000000e+00> : vector<2x2xf32>
    %62 = tpu.matmul %61, %55, %cst_67 {dimension_numbers = #tpu.dot_dimension_numbers<[1], [0], [0], [1], [0, 0, 1, 1], [], []>} : vector<2x4xf32>, vector<4x2xf32>, vector<2x2xf32> -> vector<2x2xf32>
    %63 = arith.addf %60, %62 : vector<2x2xf32>
    %cst_68 = arith.constant dense<0.000000e+00> : vector<2x4xf32>
    %64 = tpu.matmul %63, %57, %cst_68 {dimension_numbers = #tpu.dot_dimension_numbers<[1], [0], [0], [1], [0, 0, 1, 1], [], []>} : vector<2x2xf32>, vector<2x4xf32>, vector<2x4xf32> -> vector<2x4xf32>
    %cst_69 = arith.constant dense<0.000000e+00> : vector<4x4xf32>
    %65 = tpu.matmul %56, %64, %cst_69 {dimension_numbers = #tpu.dot_dimension_numbers<[1], [0], [0], [1], [0, 0, 1, 1], [], []>} : vector<4x2xf32>, vector<2x4xf32>, vector<4x4xf32> -> vector<4x4xf32>
    %66 = arith.subf %46, %65 : vector<4x4xf32>
    %c0_70 = arith.constant 0 : index
    %c0_71 = arith.constant 0 : index
    %c0_72 = arith.constant 0 : index
    %67 = vector.load %arg30[%c0_70, %c0_71, %c0_72] : memref<1x4x4xf32, #tpu.memory_space<vmem>>, vector<1x4x4xf32>
    %68 = vector.shape_cast %67 : vector<1x4x4xf32> to vector<4x4xf32>
    %69 = vector.shape_cast %66 : vector<4x4xf32> to vector<1x4x4xf32>
    tpu.vector_store %arg30[%c0_70, %c0_71, %c0_72], %69 {strides = array<i32>} : memref<1x4x4xf32, #tpu.memory_space<vmem>>, vector<1x4x4xf32>,
    %c0_73 = arith.constant 0 : index
    %c0_74 = arith.constant 0 : index
    %70 = vector.load %arg22[%c0_73, %c0_74] : memref<2x2xf32, #tpu.memory_space<vmem>>, vector<2x2xf32>
    %c0_75 = arith.constant 0 : index
    %c0_76 = arith.constant 0 : index
    %71 = vector.load %arg23[%c0_75, %c0_76] : memref<2x1xf32, #tpu.memory_space<vmem>>, vector<2x1xf32>
    %c0_77 = arith.constant 0 : index
    %c0_78 = arith.constant 0 : index
    %72 = vector.load %arg24[%c0_77, %c0_78] : memref<2x1xf32, #tpu.memory_space<vmem>>, vector<2x1xf32>
    %c0_79 = arith.constant 0 : index
    %c0_80 = arith.constant 0 : index
    %73 = vector.load %arg25[%c0_79, %c0_80] : memref<2x1xf32, #tpu.memory_space<vmem>>, vector<2x1xf32>
    %c0_81 = arith.constant 0 : index
    %c0_82 = arith.constant 0 : index
    %74 = vector.load %arg26[%c0_81, %c0_82] : memref<1x2xf32, #tpu.memory_space<vmem>>, vector<1x2xf32>
    %cst_83 = arith.constant dense<0.000000e+00> : vector<2x2xf32>
    %75 = tpu.matmul %70, %63, %cst_83 {dimension_numbers = #tpu.dot_dimension_numbers<[1], [0], [0], [1], [0, 0, 1, 1], [], []>} : vector<2x2xf32>, vector<2x2xf32>, vector<2x2xf32> -> vector<2x2xf32>
    %76 = vector.extract_strided_slice %75 {offsets = [0, 0], sizes = [1, 2], strides = [1, 1]} : vector<2x2xf32> to vector<1x2xf32>
    %cst_84 = arith.constant dense<0.000000e+00> : vector<1x1xf32>
    %77 = tpu.matmul %76, %71, %cst_84 {dimension_numbers = #tpu.dot_dimension_numbers<[1], [0], [0], [1], [0, 0, 1, 1], [], []>} : vector<1x2xf32>, vector<2x1xf32>, vector<1x1xf32> -> vector<1x1xf32>
    %78 = vector.extract_strided_slice %75 {offsets = [1, 0], sizes = [1, 2], strides = [1, 1]} : vector<2x2xf32> to vector<1x2xf32>
    %cst_85 = arith.constant dense<0.000000e+00> : vector<1x1xf32>
    %79 = tpu.matmul %78, %72, %cst_85 {dimension_numbers = #tpu.dot_dimension_numbers<[1], [0], [0], [1], [0, 0, 1, 1], [], []>} : vector<1x2xf32>, vector<2x1xf32>, vector<1x1xf32> -> vector<1x1xf32>
    %80 = arith.addf %77, %79 : vector<1x1xf32>
    %cst_86 = arith.constant dense<0.000000e+00> : vector<1x2xf32>
    %81 = tpu.matmul %80, %74, %cst_86 {dimension_numbers = #tpu.dot_dimension_numbers<[1], [0], [0], [1], [0, 0, 1, 1], [], []>} : vector<1x1xf32>, vector<1x2xf32>, vector<1x2xf32> -> vector<1x2xf32>
    %cst_87 = arith.constant dense<0.000000e+00> : vector<2x2xf32>
    %82 = tpu.matmul %73, %81, %cst_87 {dimension_numbers = #tpu.dot_dimension_numbers<[1], [0], [0], [1], [0, 0, 1, 1], [], []>} : vector<2x1xf32>, vector<1x2xf32>, vector<2x2xf32> -> vector<2x2xf32>
    %83 = arith.subf %63, %82 : vector<2x2xf32>
    %c0_88 = arith.constant 0 : index
    %c0_89 = arith.constant 0 : index
    %c0_90 = arith.constant 0 : index
    %84 = vector.load %arg31[%c0_88, %c0_89, %c0_90] : memref<1x2x2xf32, #tpu.memory_space<vmem>>, vector<1x2x2xf32>
    %85 = vector.shape_cast %84 : vector<1x2x2xf32> to vector<2x2xf32>
    %86 = vector.shape_cast %83 : vector<2x2xf32> to vector<1x2x2xf32>
    tpu.vector_store %arg31[%c0_88, %c0_89, %c0_90], %86 {strides = array<i32>} : memref<1x2x2xf32, #tpu.memory_space<vmem>>, vector<1x2x2xf32>,
    return
  }
  func.func @transform_0(%arg0: i32) -> (i32, i32, i32) {
    %c0_i32 = arith.constant 0 : i32
    %c0_i32_0 = arith.constant 0 : i32
    %c0_i32_1 = arith.constant 0 : i32
    return %arg0, %c0_i32, %c0_i32_0 : i32, i32, i32
  }
  func.func @transform_1(%arg0: i32) -> (i32, i32) {
    %c0_i32 = arith.constant 0 : i32
    %c0_i32_0 = arith.constant 0 : i32
    %c0_i32_1 = arith.constant 0 : i32
    return %c0_i32, %c0_i32_0 : i32, i32
  }
  func.func @transform_2(%arg0: i32) -> (i32, i32) {
    %c0_i32 = arith.constant 0 : i32
    %c0_i32_0 = arith.constant 0 : i32
    %c0_i32_1 = arith.constant 0 : i32
    return %c0_i32, %c0_i32_0 : i32, i32
  }
  func.func @transform_3(%arg0: i32) -> (i32, i32) {
    %c0_i32 = arith.constant 0 : i32
    %c0_i32_0 = arith.constant 0 : i32
    %c0_i32_1 = arith.constant 0 : i32
    return %c0_i32, %c0_i32_0 : i32, i32
  }
  func.func @transform_4(%arg0: i32) -> (i32, i32) {
    %c0_i32 = arith.constant 0 : i32
    %c0_i32_0 = arith.constant 0 : i32
    %c0_i32_1 = arith.constant 0 : i32
    return %c0_i32, %c0_i32_0 : i32, i32
  }
  func.func @transform_5(%arg0: i32) -> (i32, i32) {
    %c0_i32 = arith.constant 0 : i32
    %c0_i32_0 = arith.constant 0 : i32
    %c0_i32_1 = arith.constant 0 : i32
    return %c0_i32, %c0_i32_0 : i32, i32
  }
  func.func @transform_6(%arg0: i32) -> (i32, i32) {
    %c0_i32 = arith.constant 0 : i32
    %c0_i32_0 = arith.constant 0 : i32
    %c0_i32_1 = arith.constant 0 : i32
    return %c0_i32, %c0_i32_0 : i32, i32
  }
  func.func @transform_7(%arg0: i32) -> (i32, i32) {
    %c0_i32 = arith.constant 0 : i32
    %c0_i32_0 = arith.constant 0 : i32
    %c0_i32_1 = arith.constant 0 : i32
    return %c0_i32, %c0_i32_0 : i32, i32
  }
  func.func @transform_8(%arg0: i32) -> (i32, i32) {
    %c0_i32 = arith.constant 0 : i32
    %c0_i32_0 = arith.constant 0 : i32
    %c0_i32_1 = arith.constant 0 : i32
    return %c0_i32, %c0_i32_0 : i32, i32
  }
  func.func @transform_9(%arg0: i32) -> (i32, i32) {
    %c0_i32 = arith.constant 0 : i32
    %c0_i32_0 = arith.constant 0 : i32
    %c0_i32_1 = arith.constant 0 : i32
    return %c0_i32, %c0_i32_0 : i32, i32
  }
  func.func @transform_10(%arg0: i32) -> (i32, i32) {
    %c0_i32 = arith.constant 0 : i32
    %c0_i32_0 = arith.constant 0 : i32
    %c0_i32_1 = arith.constant 0 : i32
    return %c0_i32, %c0_i32_0 : i32, i32
  }
  func.func @transform_11(%arg0: i32) -> (i32, i32) {
    %c0_i32 = arith.constant 0 : i32
    %c0_i32_0 = arith.constant 0 : i32
    %c0_i32_1 = arith.constant 0 : i32
    return %c0_i32, %c0_i32_0 : i32, i32
  }
  func.func @transform_12(%arg0: i32) -> (i32, i32) {
    %c0_i32 = arith.constant 0 : i32
    %c0_i32_0 = arith.constant 0 : i32
    %c0_i32_1 = arith.constant 0 : i32
    return %c0_i32, %c0_i32_0 : i32, i32
  }
  func.func @transform_13(%arg0: i32) -> (i32, i32) {
    %c0_i32 = arith.constant 0 : i32
    %c0_i32_0 = arith.constant 0 : i32
    %c0_i32_1 = arith.constant 0 : i32
    return %c0_i32, %c0_i32_0 : i32, i32
  }
  func.func @transform_14(%arg0: i32) -> (i32, i32) {
    %c0_i32 = arith.constant 0 : i32
    %c0_i32_0 = arith.constant 0 : i32
    %c0_i32_1 = arith.constant 0 : i32
    return %c0_i32, %c0_i32_0 : i32, i32
  }
  func.func @transform_15(%arg0: i32) -> (i32, i32) {
    %c0_i32 = arith.constant 0 : i32
    %c0_i32_0 = arith.constant 0 : i32
    %c0_i32_1 = arith.constant 0 : i32
    return %c0_i32, %c0_i32_0 : i32, i32
  }
  func.func @transform_16(%arg0: i32) -> (i32, i32) {
    %c0_i32 = arith.constant 0 : i32
    %c0_i32_0 = arith.constant 0 : i32
    %c0_i32_1 = arith.constant 0 : i32
    return %c0_i32, %c0_i32_0 : i32, i32
  }
  func.func @transform_17(%arg0: i32) -> (i32, i32) {
    %c0_i32 = arith.constant 0 : i32
    %c0_i32_0 = arith.constant 0 : i32
    %c0_i32_1 = arith.constant 0 : i32
    return %c0_i32, %c0_i32_0 : i32, i32
  }
  func.func @transform_18(%arg0: i32) -> (i32, i32) {
    %c0_i32 = arith.constant 0 : i32
    %c0_i32_0 = arith.constant 0 : i32
    %c0_i32_1 = arith.constant 0 : i32
    return %c0_i32, %c0_i32_0 : i32, i32
  }
  func.func @transform_19(%arg0: i32) -> (i32, i32) {
    %c0_i32 = arith.constant 0 : i32
    %c0_i32_0 = arith.constant 0 : i32
    %c0_i32_1 = arith.constant 0 : i32
    return %c0_i32, %c0_i32_0 : i32, i32
  }
  func.func @transform_20(%arg0: i32) -> (i32, i32) {
    %c0_i32 = arith.constant 0 : i32
    %c0_i32_0 = arith.constant 0 : i32
    %c0_i32_1 = arith.constant 0 : i32
    return %c0_i32, %c0_i32_0 : i32, i32
  }
  func.func @transform_21(%arg0: i32) -> (i32, i32) {
    %c0_i32 = arith.constant 0 : i32
    %c0_i32_0 = arith.constant 0 : i32
    %c0_i32_1 = arith.constant 0 : i32
    return %c0_i32, %c0_i32_0 : i32, i32
  }
  func.func @transform_22(%arg0: i32) -> (i32, i32) {
    %c0_i32 = arith.constant 0 : i32
    %c0_i32_0 = arith.constant 0 : i32
    %c0_i32_1 = arith.constant 0 : i32
    return %c0_i32, %c0_i32_0 : i32, i32
  }
  func.func @transform_23(%arg0: i32) -> (i32, i32) {
    %c0_i32 = arith.constant 0 : i32
    %c0_i32_0 = arith.constant 0 : i32
    %c0_i32_1 = arith.constant 0 : i32
    return %c0_i32, %c0_i32_0 : i32, i32
  }
  func.func @transform_24(%arg0: i32) -> (i32, i32) {
    %c0_i32 = arith.constant 0 : i32
    %c0_i32_0 = arith.constant 0 : i32
    %c0_i32_1 = arith.constant 0 : i32
    return %c0_i32, %c0_i32_0 : i32, i32
  }
  func.func @transform_25(%arg0: i32) -> (i32, i32) {
    %c0_i32 = arith.constant 0 : i32
    %c0_i32_0 = arith.constant 0 : i32
    %c0_i32_1 = arith.constant 0 : i32
    return %c0_i32, %c0_i32_0 : i32, i32
  }
  func.func @transform_26(%arg0: i32) -> (i32, i32, i32) {
    %c0_i32 = arith.constant 0 : i32
    %c0_i32_0 = arith.constant 0 : i32
    %c0_i32_1 = arith.constant 0 : i32
    return %arg0, %c0_i32, %c0_i32_0 : i32, i32, i32
  }
  func.func @transform_27(%arg0: i32) -> (i32, i32, i32) {
    %c0_i32 = arith.constant 0 : i32
    %c0_i32_0 = arith.constant 0 : i32
    %c0_i32_1 = arith.constant 0 : i32
    return %arg0, %c0_i32, %c0_i32_0 : i32, i32, i32
  }
  func.func @transform_28(%arg0: i32) -> (i32, i32, i32) {
    %c0_i32 = arith.constant 0 : i32
    %c0_i32_0 = arith.constant 0 : i32
    %c0_i32_1 = arith.constant 0 : i32
    return %arg0, %c0_i32, %c0_i32_0 : i32, i32, i32
  }
  func.func @transform_29(%arg0: i32) -> (i32, i32, i32) {
    %c0_i32 = arith.constant 0 : i32
    %c0_i32_0 = arith.constant 0 : i32
    %c0_i32_1 = arith.constant 0 : i32
    return %arg0, %c0_i32, %c0_i32_0 : i32, i32, i32
  }
  func.func @transform_30(%arg0: i32) -> (i32, i32, i32) {
    %c0_i32 = arith.constant 0 : i32
    %c0_i32_0 = arith.constant 0 : i32
    %c0_i32_1 = arith.constant 0 : i32
    return %arg0, %c0_i32, %c0_i32_0 : i32, i32, i32
  }
}

</mosaic_0001>

<bundles_post_ra>
// kernel: tpu_custom_call.1
= control target key start
LH: loop header
LB: loop body
LE: loop exit
PB: predicated region body
PF: predicated region fallthrough
CT: control target
= control target key end

     0   :  { %s2346_s6 = smov 1   ;;  %s2347_s10 = smov 2   ;;  %s2842_s0 = inlined_call_operand.smem [shape: u32[31], index: -1, kind: input, shape index: {}] }
   0x1   :  { %s2388_s5 = sld [smem:[%s2842_s0]]   ;;  %s2348_s14 = smov 3  }
   0x2   :  { %s2393_s9 = sld [smem:[%s2842_s0 + %s2346_s6]]   ;;  %s2349_s18 = smov 4  }
   0x3   :  { %s2398_s13 = sld [smem:[%s2842_s0 + %s2347_s10]]   ;;  %s2350_s22 = smov 5  }
   0x4   :  { %s2403_s17 = sld [smem:[%s2842_s0 + %s2348_s14]]   ;;  %s2351_s26 = smov 6  }
   0x5   :  { %s2408_s21 = sld [smem:[%s2842_s0 + %s2349_s18]]   ;;  %s2352_s30 = smov 7  }
   0x6   :  { %s2413_s25 = sld [smem:[%s2842_s0 + %s2350_s22]]   ;;  %s2353_s4 = smov 8  }
   0x7   :  { %2861 = sst [smem:[#allocation12_spill]] %s2388_s5  ;;  %s2354_s10 = smov 9  }
   0x8   :  { %2862 = sst [smem:[#allocation13_spill]] %s2393_s9  ;;  %s2355_s15 = smov 10  }
   0x9   :  { %2863 = sst [smem:[#allocation14_spill]] %s2398_s13  ;;  %s2356_s20 = smov 11  }
   0xa   :  { %s2418_s29 = sld [smem:[%s2842_s0 + %s2351_s26]]   ;;  %s2357_s26 = smov 12  }
   0xb   :  { %s2423_s3 = sld [smem:[%s2842_s0 + %s2352_s30]]   ;;  %s2358_s1 = smov 13  }
   0xc   :  { %s2428_s8 = sld [smem:[%s2842_s0 + %s2353_s4]]   ;;  %s2359_s7 = smov 14  }
   0xd   :  { %s2433_s14 = sld [smem:[%s2842_s0 + %s2354_s10]]   ;;  %s2361_s22 = smov 16  }
   0xe   :  { %s2438_s19 = sld [smem:[%s2842_s0 + %s2355_s15]]   ;;  %s2360_s15 = smov 15  }
   0xf   :  { %s2443_s24 = sld [smem:[%s2842_s0 + %s2356_s20]]   ;;  %s2362_s28 = smov 17  }
  0x10   :  { %s2448_s30 = sld [smem:[%s2842_s0 + %s2357_s26]]  }
  0x11   :  { %2864 = sst [smem:[#allocation15_spill]] %s2423_s3 }
  0x12   :  { %2865 = sst [smem:[#allocation16_spill]] %s2428_s8 }
  0x13   :  { %2866 = sst [smem:[#allocation17_spill]] %s2433_s14 }
  0x14   :  { %s2453_s6 = sld [smem:[%s2842_s0 + %s2358_s1]]  }
  0x15   :  { %s2458_s12 = sld [smem:[%s2842_s0 + %s2359_s7]]   ;;  %s2363_s7 = smov 18  }
  0x16   :  { %s2463_s20 = sld [smem:[%s2842_s0 + %s2360_s15]]   ;;  %s2364_s15 = smov 19  }
  0x17   :  { %s2468_s27 = sld [smem:[%s2842_s0 + %s2361_s22]]   ;;  %s2365_s22 = smov 20  }
  0x18   :  { %s2473_s4 = sld [smem:[%s2842_s0 + %s2362_s28]]   ;;  %s2366_s28 = smov 21  }
  0x1a   :  { %2867 = sst [smem:[#allocation18_spill]] %s2453_s6 }
  0x1b   :  { %2868 = sst [smem:[#allocation19_spill]] %s2458_s12 }
  0x1c   :  { %2869 = sst [smem:[#allocation20_spill]] %s2463_s20 }
  0x1d   :  { %2870 = sst [smem:[#allocation21_spill]] %s2468_s27 }
  0x1e   :  { %2871 = sst [smem:[#allocation22_spill]] %s2473_s4 }
  0x1f   :  { %s2478_s12 = sld [smem:[%s2842_s0 + %s2363_s7]]   ;;  %s2367_s7 = smov 22  }
  0x20   :  { %s2483_s20 = sld [smem:[%s2842_s0 + %s2364_s15]]   ;;  %s2368_s15 = smov 23  }
  0x21   :  { %s2488_s27 = sld [smem:[%s2842_s0 + %s2365_s22]]   ;;  %s2369_s22 = smov 24  }
  0x22   :  { %s2493_s4 = sld [smem:[%s2842_s0 + %s2366_s28]]   ;;  %s2370_s28 = smov 25  }
  0x25   :  { %2872 = sst [smem:[#allocation23_spill]] %s2478_s12 }
  0x26   :  { %2873 = sst [smem:[#allocation24_spill]] %s2483_s20 }
  0x27   :  { %2874 = sst [smem:[#allocation25_spill]] %s2488_s27 }
  0x28   :  { %2875 = sst [smem:[#allocation26_spill]] %s2493_s4 }
  0x29   :  { %s2498_s12 = sld [smem:[%s2842_s0 + %s2367_s7]]   ;;  %s2371_s7 = smov 26  }
  0x2a   :  { %s2503_s20 = sld [smem:[%s2842_s0 + %s2368_s15]]   ;;  %s2372_s15 = smov 27  }
  0x2b   :  { %s2508_s27 = sld [smem:[%s2842_s0 + %s2369_s22]]   ;;  %s2373_s22 = smov 28  }
  0x2c   :  { %s2513_s4 = sld [smem:[%s2842_s0 + %s2370_s28]]   ;;  %s2374_s28 = smov 29  }
  0x2f   :  { %2876 = sst [smem:[#allocation27_spill]] %s2498_s12 }
  0x30   :  { %2877 = sst [smem:[#allocation28_spill]] %s2503_s20 }
  0x31   :  { %2878 = sst [smem:[#allocation29_spill]] %s2508_s27 }
  0x32   :  { %2879 = sst [smem:[#allocation30_spill]] %s2513_s4 }
  0x33   :  { %s2518_s12 = sld [smem:[%s2842_s0 + %s2371_s7]]   ;;  %s2375_s7 = smov 30  }
  0x34   :  { %s2523_s20 = sld [smem:[%s2842_s0 + %s2372_s15]]  }
  0x35   :  { %s2528_s27 = sld [smem:[%s2842_s0 + %s2373_s22]]  }
  0x36   :  { %s2533_s4 = sld [smem:[%s2842_s0 + %s2374_s28]]  }
  0x39   :  { %2880 = sst [smem:[#allocation31_spill]] %s2518_s12 }
  0x3a   :  { %2881 = sst [smem:[#allocation32_spill]] %s2523_s20 }
  0x3b   :  { %2882 = sst [smem:[#allocation33_spill]] %s2528_s27 }
  0x3c   :  { %2883 = sst [smem:[#allocation34_spill]] %s2533_s4 }
  0x3d   :  { %s2538_s12 = sld [smem:[%s2842_s0 + %s2375_s7]]  }
  0x43   :  { %2884 = sst [smem:[#allocation35_spill]] %s2538_s12 }
  0x44   :  { %67 = vsyncpa [#allocation3], 0 }
  0x45   :  { %69 = vsyncpa [#allocation3 + $0x1], 0 }
  0x46   :  { %70 = vsyncpa [#allocation4], 0 }
  0x47   :  { %72 = vsyncpa [#allocation4 + $0x1], 0 }
  0x48   :  { %73 = vsyncpa [#allocation7], 0 }
  0x49   :  { %75 = vsyncpa [#allocation7 + $0x1], 0  ;;  %s2540_s15 = smov 0   ;;  %s2542_s16 = smov 0  }
  0x4a   :  { %s2544_s18 = smov 0   ;;  %s2546_s22 = smov 0  }
  0x4b LB: > { %s2885_s14 = sld [smem:[#allocation17_spill]]  ;;  %s2561_s0 = sadd.s32 4294967295, %s2344_s22   ;;  %s2336_s16 = sphi %s2542_s16, %s2929_s16   ;;  %s2332_s15 = sphi %s2540_s15, %s2928_s15   ;;  %s2344_s22 = sphi %s2546_s22, %s2925_s22   ;;  %s2340_s18 = sphi %s2544_s18, %s2930_s18  }
  0x4c   : > { %s2886_s13 = sld [smem:[#allocation14_spill]]  ;;  %s2849_s23 = sadd.s32 4294967294, %s2344_s22  }
  0x4d   : > { %s2887_s9 = sld [smem:[#allocation13_spill]]  ;;  %s2565_s26 = sadd.s32 1, %s2344_s22  }
  0x4e   : > { %s2888_s8 = sld [smem:[#allocation16_spill]]  ;;  %s88_s28 = sadd.s32 1, %s2340_s18 }
  0x4f   : > { %s2889_s5 = sld [smem:[#allocation12_spill]]  ;;  %s85_s1 = ssub.s32 %s2344_s22, %s2565_s26 }
  0x50   : > { %s2890_s3 = sld [smem:[#allocation15_spill]]  ;;  %p95_p0 = scmp.ne.s32.totalorder %s2340_s18, %s2336_s16 }
  0x51   : > { %2891 = sst [smem:[#allocation36_spill]] %s2332_s15  ;;  %p86_p1 = scmp.eq.s32.totalorder %s85_s1, 0 }
  0x52   : > { %2892 = sst [smem:[#allocation37_spill]] %s2340_s18  ;;  %p96_p2 = scmp.eq.s32.totalorder %s2344_s22, 0 }
  0x53   : > { %2893 = sst [smem:[#allocation38_spill]] %s2565_s26  ;;  %p101_p3 = scmp.ne.s32.totalorder %s2336_s16, %s2332_s15 }
  0x54   : > { %p102_p4 = scmp.eq.s32.totalorder %s2561_s0, 0  ;;  %p2579_p5 = por %p96_p2, %p95_p0 }
  0x55   : > { %s2577_s2 = scalar_select %p86_p1, %s2340_s18, %s88_s28  }
  0x56   : > { %p2583_p6 = por %p102_p4, %p101_p3  ;;  %p650_p7 = scmp.eq.s32.totalorder %s2561_s0, 5 }
  0x57   : > { %2894 = sst [smem:[#allocation39_spill]] %s2577_s2  ;;  %p656_p8 = scmp.eq.s32.totalorder %s2849_s23, 5 }
  0x58   : > { %p2120_p9 = scmp.lt.s32.totalorder %s2344_s22, 6  ;;  %p2591_p10 = por %p650_p7, %p95_p0 }
  0x59   : > { %p2595_p11 = por %p656_p8, %p101_p3  ;;  %s855_s1 = sand.u32 1, %s2340_s18  }
  0x5a   : > { %s2897_s11 = scalar_select %p2591_p10, 1, 0 }
  0x5b   : > { %s2899_s28 = scalar_select %p2595_p11, 1, 0 }
  0x5c   : > { %2898 = sst [smem:[#allocation40_spill]] %s2897_s11  ;;  %s2095_s2 = sshll.u32 %s2344_s22, 5 }
  0x5d   : > { %2900 = sst [smem:[#allocation41_spill]] %s2899_s28  ;;  %s2027_s26 = sshll.u32 %s855_s1, 5 }
  0x5e   : > { %s864_s15 = scalar_lea.hbm %s2889_s5, %s2095_s2  ;;  %s859_s27 = scalar_lea.vmem [#allocation2], %s2027_s26 }
  0x5f   : > { %s865_s12 = sshll.u32 %s864_s15, 4  ;;  %s867_s20 = sshll.u32 %s859_s27, 4  ;;  %s866_s12 = int_to_ptr.hbm [resolvable:$true] %s865_s12  ;;  %s868_s20 = int_to_ptr.vmem [resolvable:$true] %s867_s20 }
  0x60   : > { %p2604_p12 = pnand %p2120_p9, %p2579_p5  ;;  %p2030_p13 = scmp.ge.s32.totalorder %s2344_s22, 1 }
  0x61   : > { %p875_p0 = scmp.lt.s32.totalorder %s2344_s22, 7  ;;  %s856_s28 = scalar_lea.sflag [#allocation3], %s855_s1 }
  0x62   : > { %s2188_s18 = sshra.s32 %s866_s12, 4  ;;  %p2192_p2 = pneg %p2604_p12  ;;  %s2189_s18 = int_to_ptr.hbm [resolvable:$true] %s2188_s18 }
  0x63   : > { %s2190_s11 = scalar_lea.hbm %s2189_s18, 32  ;;  %s2195_s27 = scalar_lea.hbm %s2889_s5, 192 }
  0x64   : > { %p2191_p1 = scmp.ne.s32.totalorder %s2189_s18, %s2190_s11  ;;  %p2196_p7 = scmp.lt.s32.totalorder %s2189_s18, %s2889_s5 }
  0x65   : > { %p2197_p8 = scmp.lt.s32.totalorder %s2195_s27, %s2190_s11 }
  0x66   : > { %p2193_p3 = pnand %p2192_p2, %p2191_p1 }
  0x67   : > { %p2198_p11 = por %p2197_p8, %p2196_p7 }
  0x68   : > { %p2194_p4 = pneg %p2193_p3 }
  0x6a   : > { %p2199_p5 = pnand %p2198_p11, %p2194_p4 }
  0x6c   : > { %2202 = shalt.err (!%p2199_p5)
}
  0x6d   : > { %s2376_s15 = smov 128   ;;  %s2377_s26 = smov 8  }
  0x6e   : > { %2109 = dma.hbm_to_vmem [thread:$0]  (!%p2604_p12), %s866_s12, 512, %s868_s20, %s856_s28, %s2376_s15, %s2376_s15, %s2377_s26  }
  0x6f   : > { %p876_p9 = pnand %p2030_p13, %p875_p0 }
  0x70   : > { %s2621_s2 = sand.u32 (!%p876_p9), 1, %s2336_s16  }
  0x71   : > { %879 = sbr.rel (%p876_p9) target bundleno = 1745 (0x6d1), region = 124  ;;  %s2031_s18 = sshll.u32 (!%p876_p9), %s2621_s2, 5 }
  0x72   : > { %s882_s7 = scalar_lea.sflag (!%p876_p9), [#allocation3], %s2621_s2  ;;  %s885_s11 = scalar_lea.vmem (!%p876_p9), [#allocation2], %s2031_s18 }
  0x76   : > { %2319 = dma.done.wait (%p2583_p6), %s882_s7, 512  }
  0x77   : > { %2321 = vsyncadd (%p2583_p6), %s882_s7, 4294966784  ;;  %v2631_v0 = vld [vmem:[%s885_s11 + $0x18] sm:$0xff]  ;;  %v2633_v1 = vld [vmem:[%s885_s11 + $0x10] sm:$0xff]  ;;  %vm1011_vm0 = vcmask 261120   ;;  %vm1111_vm1 = vcmask 130048   ;;  %s2902_s6 = sld [smem:[#allocation18_spill]] }
  0x78   : > { %1036 = vmatpush.msra.mxu0 %v2631_v0  ;;  %v2636_v2 = vld [vmem:[%s885_s11 + $0x8] sm:$0xff]  ;;  %v1000_v3 = vld [vmem:[%s2886_s13 + $0x18] sm:$0xff]  ;;  %v999_v4 = vld [vmem:[%s2886_s13 + $0x10] sm:$0xff]  ;;  %vm1274_vm2 = vcmask 64512   ;;  %s2903_s12 = sld [smem:[#allocation20_spill]]  ;;  %vm1409_vm3 = vcmask 1043456  }
  0x79   : > { %1100 = vmatpush.msra.mxu2 %v1000_v3  ;;  %v2641_v5 = vld [vmem:[%s885_s11] sm:$0xff]  ;;  %v998_v6 = vld [vmem:[%s2886_s13 + $0x8] sm:$0xff]  ;;  %v995_v9 = vld [vmem:[%s2887_s9 + $0x10] sm:$0xff]  ;;  %s2714_s20 = scalar_lea.vmem [#allocation5], %s2031_s18  ;;  %s2904_s23 = sld [smem:[#allocation21_spill]]  ;;  %vm1405_vm4 = vcmask 31744  }
  0x7a   : > { %1037 = vmatpush.msra.mxu0 %v2633_v1  ;;  %v993_v7 = vld [vmem:[%s2887_s9] sm:$0xff]  ;;  %v994_v8 = vld [vmem:[%s2887_s9 + $0x8] sm:$0xff]  ;;  %v996_v10 = vld [vmem:[%s2887_s9 + $0x18] sm:$0xff]  ;;  %s2033_s10 = sshll.u32 %s2621_s2, 4  ;;  %s2905_s1 = sld [smem:[#allocation22_spill]]  ;;  %vm1547_vm5 = vcmask 1041408  }
  0x7b   : > { %1101 = vmatpush.msra.mxu2 %v999_v4  ;;  %v997_v11 = vld [vmem:[%s2886_s13] sm:$0xff]  ;;  %v1004_v12 = vld [vmem:[%s2403_s17 + $0x18] sm:$0xff]  ;;  %v1003_v13 = vld [vmem:[%s2403_s17 + $0x10] sm:$0xff]  ;;  %s2724_s28 = scalar_lea.vmem [#allocation6], %s2033_s10  ;;  %s2906_s27 = sld [smem:[#allocation23_spill]]  ;;  %vm1543_vm6 = vcmask 15360  }
  0x7c   : > { %1038 = vmatpush.msra.mxu0 %v2636_v2  ;;  %1071 = vmatpush.msra.mxu1 %v1004_v12  ;;  %v1002_v14 = vld [vmem:[%s2403_s17 + $0x8] sm:$0xff]  ;;  %v1001_v15 = vld [vmem:[%s2403_s17] sm:$0xff]  ;;  %v1007_v47 = vld [vmem:[%s2408_s21 + $0x10] sm:$0xff]  ;;  %s2907_s15 = sld [smem:[#allocation19_spill]]  ;;  %vm1686_vm7 = vcmask 1040384   ;;  %p981_p6 = scmp.lt.s32.totalorder %s2561_s0, 5 }
  0x7d   : > { %1102 = vmatpush.msra.mxu2 %v998_v6  ;;  %v1010_v20 = vld [vmem:[%s2413_s25 + $0x8] sm:$0xff]  ;;  %v1009_v21 = vld [vmem:[%s2413_s25] sm:$0xff]  ;;  %v1008_v53 = vld [vmem:[%s2408_s21 + $0x18] sm:$0xff]  ;;  %s2908_s26 = sld [smem:[#allocation25_spill]]  ;;  %vm1598_vm8 = vcmask 27648   ;;  %vm1682_vm9 = vcmask 7168  }
  0x7e   : > { %1039 = vmatpush.msra.mxu0 %v2641_v5  ;;  %1072 = vmatpush.msra.mxu1 %v1003_v13  ;;  %v1190_v28 = vld [vmem:[%s2418_s29] sm:$0xff]  ;;  %v1191_v29 = vld [vmem:[%s2418_s29 + $0x8] sm:$0xff]  ;;  %s2909_s18 = sld [smem:[#allocation26_spill]] }
  0x7f   : > { %2037 = vmatmul.msk.f32.vlgmr.msra.gmra.mxu0 %vm1011_vm0, %v993_v7  ;;  %1103 = vmatpush.msra.mxu2 %v997_v11  ;;  %v1195_v30 = vld [vmem:[%s2888_s8 + $0x8] sm:$0xff]  ;;  %v1194_v31 = vld [vmem:[%s2888_s8] sm:$0xff]  ;;  %s2910_s7 = sld [smem:[#allocation27_spill]] }
  0x80   : > { %1073 = vmatpush.msra.mxu1 %v1002_v14  ;;  %1132 = vmatpush.msra.mxu3 %v1010_v20  ;;  %v1193_v32 = vld [vmem:[%s2890_s3 + $0x8] sm:$0xff]  ;;  %v1192_v33 = vld [vmem:[%s2890_s3] sm:$0xff]  ;;  %s2911_s11 = sld [smem:[#allocation28_spill]]  ;;  %s1744_s3 = sand.u32 1, %s2561_s0  }
  0x81   : > { %1245 = vmatpush.msrb.mxu2 %v1195_v30  ;;  %v1198_v38 = vld [vmem:[%s2438_s19] sm:$0xff]  ;;  %v1006_v46 = vld [vmem:[%s2408_s21 + $0x8] sm:$0xff]  ;;  %s2914_s4 = sld [smem:[#allocation34_spill]]  ;;  %s2792_s5 = scalar_lea.sflag [#allocation7], %s1744_s3 }
  0x82   : > { %1074 = vmatpush.msra.mxu1 %v1001_v15  ;;  %1133 = vmatpush.msra.mxu3 %v1009_v21  ;;  %v1331_v42 = vld [vmem:[%s2443_s24] sm:$0xff]  ;;  %v1197_v51 = vld [vmem:[%s2885_s14 + $0x8] sm:$0xff] }
  0x83   : > { %1246 = vmatpush.msrb.mxu2 %v1194_v31  ;;  %1293 = vmatpush.msrb.mxu0 %v1198_v38  ;;  %v1332_v43 = vld [vmem:[%s2448_s30] sm:$0xff] }
  0x84   : > { %v1333_v44 = vld [vmem:[%s2902_s6] sm:$0xff] }
  0x85   : > { %1378 = vmatpush.msra.mxu0 %v1333_v44  ;;  %v1005_v45 = vld [vmem:[%s2408_s21] sm:$0xff] }
  0x86   : > { %v1196_v48 = vld [vmem:[%s2885_s14] sm:$0xff] }
  0x87   : > { %2038 = vmatmul.msk.f32.gmra.mxu0 %vm1011_vm0, %v994_v8  ;;  %v1335_v54 = vld [vmem:[%s2903_s12] sm:$0xf]  ;;  %s2034_s12 = sshll.u32 %s2621_s2, 3 }
  0x88   : > { %v1462_v8 = vld [vmem:[%s2905_s1] sm:$0xf]  ;;  %s2756_s10 = scalar_lea.vmem [#allocation8], %s2034_s12  ;;  %s2913_s1 = sld [smem:[#allocation30_spill]] }
  0x89   : > { %v1334_v12 = vld [vmem:[%s2907_s15] sm:$0xff]  ;;  %s2778_s15 = scalar_select %p981_p6, %s2561_s0, 5 }
  0x8a   : > { %v1601_v20 = vld [vmem:[%s2910_s7] sm:$0x3]  ;;  %s2916_s7 = sld [smem:[#allocation32_spill]]  ;;  %s1770_s12 = sshll.u32 %s2714_s20, 4  ;;  %s2786_s12 = int_to_ptr.vmem [resolvable:$true] %s1770_s12 }
  0x8b   : > { %v1602_v21 = vld [vmem:[%s2911_s11] sm:$0x3]  ;;  %s1787_s11 = sshll.u32 %s2724_s28, 4  ;;  %s1788_s11 = int_to_ptr.vmem [resolvable:$true] %s1787_s11 }
  0x8f   : > { %2039 = vmatmul.msk.f32.gmra.mxu0 %vm1011_vm0, %v995_v9  ;;  %v1463_v9 = vld [vmem:[%s2906_s27] sm:$0xf]  ;;  %s2915_s27 = sld [smem:[#allocation29_spill]] }
  0x97   : > { %2040 = vmatmul.msk.f32.gmra.mxu0 %vm1011_vm0, %v996_v10 }
  0xfc   : > { %v1041_v16 = vpop.f32.mrf.mxu0 }
  0xfd   : > { %2043 = vmatmul.msk.f32.vlgmr.msra.gmra.mxu2 %vm1011_vm0, %v1041_v16 }
  0xfe   : > { %1268 = vmatpush.msra.mxu2 %v1193_v32  ;;  %v1603_v32 = vld [vmem:[%s2915_s27] sm:$0x3]  ;;  %s2238_s27 = scalar_lea.hbm %s2916_s7, 96 }
 0x100   : > { %1269 = vmatpush.msra.mxu2 %v1192_v33 }
 0x104   : > { %v1044_v17 = vpop.f32.mrf.mxu0 }
 0x105   : > { %2044 = vmatmul.msk.f32.gmra.mxu2 %vm1011_vm0, %v1044_v17 }
 0x10c   : > { %v1047_v18 = vpop.f32.mrf.mxu0 }
 0x10d   : > { %2041 = vmatmul.msk.f32.vlgmr.msra.gmra.mxu1 %vm1011_vm0, %v1047_v18 }
 0x114   : > { %v1050_v19 = vpop.f32.mrf.mxu0 }
 0x115   : > { %2042 = vmatmul.msk.f32.gmra.mxu1 %vm1011_vm0, %v1050_v19  ;;  %v1600_v19 = vld [vmem:[%s2909_s18] sm:$0x3] }
 0x180   : > { %v1105_v22 = vpop.f32.mrf.mxu2 }
 0x188   : > { %v1108_v25 = vpop.f32.mrf.mxu2 }
 0x18a   : > { %v1076_v23 = vpop.f32.mrf.mxu1 }
 0x18b   : > { %v2665_v24 = vadd.f32 %v1105_v22, %v1076_v23 }
 0x18d   : > { %2045 = vmatmul.msk.f32.vlgmr.msra.gmra.mxu3 %vm1111_vm1, %v2665_v24 }
 0x192   : > { %v1079_v26 = vpop.f32.mrf.mxu1 }
 0x193   : > { %v2669_v27 = vadd.f32 %v1108_v25, %v1079_v26  ;;  %v1604_v26 = vld [vmem:[%s2913_s1] sm:$0x1]  ;;  %s2097_s1 = sshll.u32 %s2561_s0, 4 }
 0x195   : > { %2046 = vmatmul.msk.f32.gmra.mxu3 %vm1111_vm1, %v2669_v27  ;;  %1219 = vmatpush.msrb.mxu1 %v2669_v27 }
 0x197   : > { %1220 = vmatpush.msrb.mxu1 %v2665_v24 }
 0x198   : > { %2051 = vmatmul.msk.f32.vlgmr.msrb.gmra.mxu1 %vm1111_vm1, %v1190_v28 }
 0x1a0   : > { %2052 = vmatmul.msk.f32.gmra.mxu1 %vm1111_vm1, %v1191_v29 }
 0x210   : > { %v1135_v34 = vpop.f32.mrf.mxu3 }
 0x215   : > { %v1222_v35 = vpop.f32.mrf.mxu1 }
 0x218   : > { %v1138_v36 = vpop.f32.mrf.mxu3 }
 0x219   : > { %1167 = vmatpush.msrb.mxu3 %v1138_v36 }
 0x21b   : > { %1168 = vmatpush.msrb.mxu3 %v1135_v34 }
 0x21c   : > { %2047 = vmatmul.msk.f32.vlgmr.msrb.gmra.mxu3 %vm1111_vm1, %v1005_v45 }
 0x21d   : > { %v1225_v37 = vpop.f32.mrf.mxu1  ;;  %2061 = vmatpush.msk.msra.mxu3 %vm1409_vm3, %v1335_v54 }
 0x21e   : > { %2053 = vmatmul.msk.f32.vlgmr.msrb.gmra.mxu2 %vm1111_vm1, %v1225_v37 }
 0x21f   : > { %2069 = vmatpush.msk.msrb.mxu3 %vm1409_vm3, %v1462_v8 }
 0x224   : > { %2048 = vmatmul.msk.f32.gmra.mxu3 %vm1111_vm1, %v1006_v46 }
 0x226   : > { %2054 = vmatmul.msk.f32.vlgmr.msra.gmra.mxu2 %vm1111_vm1, %v1222_v35 }
 0x22c   : > { %2049 = vmatmul.msk.f32.gmra.mxu3 %vm1111_vm1, %v1007_v47 }
 0x234   : > { %2050 = vmatmul.msk.f32.gmra.mxu3 %vm1111_vm1, %v1008_v53 }
 0x29f   : > { %v1170_v55 = vpop.f32.mrf.mxu3 }
 0x2a0   : > { %v1182_v56 = vsub.f32 %v2641_v5, %v1170_v55  ;;  %v1461_v5 = vld [vmem:[%s2904_s23] sm:$0xf]  ;;  %s2912_s23 = sld [smem:[#allocation24_spill]] }
 0x2a1   : > { %v1248_v39 = vpop.f32.mrf.mxu2 }
 0x2a2   : > { %1186 = vst.msk [vmem:[%s2714_s20] sm:$0xff] %vm1011_vm0, %v1182_v56 }
 0x2a6   : > { %v1464_v22 = vld [vmem:[%s2912_s23] sm:$0xf] }
 0x2a7   : > { %v1173_v57 = vpop.f32.mrf.mxu3 }
 0x2a8   : > { %v1183_v58 = vsub.f32 %v2636_v2, %v1173_v57 }
 0x2a9   : > { %v1271_v40 = vpop.f32.mrf.mxu2 }
 0x2aa   : > { %v2686_v41 = vadd.f32 %v1271_v40, %v1248_v39  ;;  %1187 = vst.msk [vmem:[%s2714_s20 + $0x8] sm:$0xff] %vm1011_vm0, %v1183_v58 }
 0x2ac   : > { %2055 = vmatmul.msk.f32.vlgmr.msrb.gmra.mxu0 %vm1274_vm2, %v2686_v41  ;;  %1354 = vmatpush.msrb.mxu2 %v2686_v41 }
 0x2ad   : > { %2058 = vmatmul.msk.f32.vlgmr.msrb.gmra.mxu2 %vm1274_vm2, %v1331_v42 }
 0x2ae   : > { %1400 = vmatpush.msra.mxu2 %v1332_v43 }
 0x2af   : > { %v1176_v60 = vpop.f32.mrf.mxu3 }
 0x2b0   : > { %v1184_v62 = vsub.f32 %v2633_v1, %v1176_v60  ;;  %2067 = vmatpush.msk.msrb.mxu2 %vm1409_vm3, %v1463_v9 }
 0x2b2   : > { %1188 = vst.msk [vmem:[%s2714_s20 + $0x10] sm:$0xff] %vm1011_vm0, %v1184_v62 }
 0x2b7   : > { %v1179_v6 = vpop.f32.mrf.mxu3 }
 0x2b8   : > { %v1185_v7 = vsub.f32 %v2631_v0, %v1179_v6  ;;  %v1465_v0 = vld [vmem:[%s2908_s26] sm:$0x3]  ;;  %s2035_s26 = sshll.u32 %s2778_s15, 2 }
 0x2b9   : > { %s984_s18 = scalar_lea.vmem %s2914_s4, %s2035_s26  ;;  %s1786_s26 = scalar_lea.hbm %s2916_s7, %s2097_s1 }
 0x2ba   : > { %1189 = vst.msk [vmem:[%s2714_s20 + $0x18] sm:$0xff] %vm1011_vm0, %v1185_v7  ;;  %s1789_s4 = sshll.u32 %s1786_s26, 4  ;;  %s1790_s4 = int_to_ptr.hbm [resolvable:$true] %s1789_s4 }
 0x329   : > { %v1295_v49 = vpop.f32.mrf.mxu0 }
 0x32a   : > { %1319 = vmatpush.msra.mxu1 %v1295_v49 }
 0x32b   : > { %2056 = vmatmul.msk.f32.vlgmr.msra.gmra.mxu1 %vm1274_vm2, %v1196_v48 }
 0x330   : > { %v1356_v50 = vpop.f32.mrf.mxu2 }
 0x331   : > { %v1360_v52 = vrot.slane %v1356_v50, 4  ;;  %2060 = vmatmul.msk.f32.vlgmr.msra.gmra.mxu2 %vm1274_vm2, %v1356_v50 }
 0x333   : > { %2057 = vmatmul.msk.f32.gmra.mxu1 %vm1274_vm2, %v1197_v51  ;;  %2059 = vmatmul.msk.f32.vlgmr.msra.gmra.mxu0 %vm1274_vm2, %v1360_v52 }
 0x3a8   : > { %v1321_v59 = vpop.f32.mrf.mxu1 }
 0x3a9   : > { %v1327_v61 = vsub.f32 %v2665_v24, %v1321_v59 }
 0x3ab   : > { %1329 = vst.msk [vmem:[%s2724_s28] sm:$0xff] %vm1111_vm1, %v1327_v61 }
 0x3b0   : > { %v1324_v63 = vpop.f32.mrf.mxu1  ;;  %v1380_v3 = vpop.f32.mrf.mxu0 }
 0x3b1   : > { %v1328_v2 = vsub.f32 %v2669_v27, %v1324_v63 }
 0x3b3   : > { %1330 = vst.msk [vmem:[%s2724_s28 + $0x8] sm:$0xff] %vm1111_vm1, %v1328_v2  ;;  %s2232_s28 = sshra.s32 %s1790_s4, 4  ;;  %s2233_s28 = int_to_ptr.hbm [resolvable:$true] %s2232_s28 }
 0x3b4   : > { %v1402_v4 = vpop.f32.mrf.mxu2  ;;  %s2234_s20 = scalar_lea.hbm %s2233_s28, 16  ;;  %p2239_p0 = scmp.lt.s32.totalorder %s2233_s28, %s2916_s7 }
 0x3b5   : > { %v1403_v1 = vadd.f32 %v1402_v4, %v1380_v3  ;;  %p2235_p11 = scmp.ne.s32.totalorder %s2233_s28, %s2234_s20  ;;  %p2240_p1 = scmp.lt.s32.totalorder %s2238_s27, %s2234_s20 }
 0x3b7   : > { %2062 = vmatmul.msk.f32.vlgmr.msra.gmra.mxu3 %vm1405_vm4, %v1403_v1  ;;  %2065 = vmatpush.msk.msrb.mxu1 %vm1409_vm3, %v1403_v1  ;;  %p2236_p12 = pnand %p2235_p11, %p2591_p10  ;;  %p2241_p2 = por %p2240_p1, %p2239_p0 }
 0x3b8   : > { %2066 = vmatmul.msk.f32.vlgmr.msrb.gmra.mxu1 %vm1405_vm4, %v1461_v5  ;;  %2077 = vmatpush.msk.msra.mxu3 %vm1547_vm5, %v1602_v21 }
 0x3b9   : > { %p2237_p13 = pneg %p2236_p12 }
 0x3bb   : > { %p2242_p3 = pnand %p2241_p2, %p2237_p13 }
 0x435   : > { %v1488_v10 = vpop.f32.mrf.mxu1 }
 0x436   : > { %v1492_v11 = vrot.slane %v1488_v10, 2  ;;  %2070 = vmatmul.msk.f32.vlgmr.msrb.gmra.mxu3 %vm1405_vm4, %v1488_v10 }
 0x438   : > { %2068 = vmatmul.msk.f32.vlgmr.msrb.gmra.mxu2 %vm1405_vm4, %v1492_v11 }
 0x43a   : > { %v1430_v13 = vpop.f32.mrf.mxu3 }
 0x43b   : > { %2063 = vmatpush.msk.msrb.mxu0 %vm1409_vm3, %v1430_v13 }
 0x43c   : > { %2064 = vmatmul.msk.f32.vlgmr.msrb.gmra.mxu0 %vm1405_vm4, %v1334_v12 }
 0x43d   : > { %2071 = vmatpush.msk.msra.mxu0 %vm1547_vm5, %v1465_v0 }
 0x43f   : > { %2079 = vmatpush.msk.msrb.mxu0 %vm1547_vm5, %v1601_v20 }
 0x4b9   : > { %v1456_v14 = vpop.f32.mrf.mxu0  ;;  %v1540_v17 = vpop.f32.mrf.mxu3 }
 0x4ba   : > { %v1459_v15 = vsub.f32 %v2686_v41, %v1456_v14 }
 0x4bb   : > { %v1515_v16 = vpop.f32.mrf.mxu2 }
 0x4bc   : > { %v2753_v18 = vadd.f32 %v1540_v17, %v1515_v16  ;;  %1460 = vst.msk [vmem:[%s2756_s10] sm:$0xff] %vm1274_vm2, %v1459_v15 }
 0x4be   : > { %2072 = vmatmul.msk.f32.vlgmr.msra.gmra.mxu0 %vm1543_vm6, %v2753_v18  ;;  %2075 = vmatpush.msk.msra.mxu2 %vm1547_vm5, %v2753_v18 }
 0x4bf   : > { %2076 = vmatmul.msk.f32.vlgmr.msra.gmra.mxu2 %vm1543_vm6, %v1600_v19 }
 0x53b   : > { %v1568_v23 = vpop.f32.mrf.mxu0 }
 0x53c   : > { %2073 = vmatpush.msk.msra.mxu1 %vm1547_vm5, %v1568_v23 }
 0x53d   : > { %2074 = vmatmul.msk.f32.vlgmr.msra.gmra.mxu1 %vm1543_vm6, %v1464_v22 }
 0x53e   : > { %2081 = vmatpush.msk.msrb.mxu1 %vm1686_vm7, %v1604_v26 }
 0x542   : > { %v1627_v24 = vpop.f32.mrf.mxu2 }
 0x543   : > { %v1631_v25 = vrot.slane %v1627_v24, 1  ;;  %2080 = vmatmul.msk.f32.vlgmr.msrb.gmra.mxu0 %vm1543_vm6, %v1627_v24 }
 0x545   : > { %2078 = vmatmul.msk.f32.vlgmr.msra.gmra.mxu3 %vm1543_vm6, %v1631_v25 }
 0x5ba   : > { %v1594_v27 = vpop.f32.mrf.mxu1 }
 0x5bb   : > { %v1597_v28 = vsub.f32 %v1403_v1, %v1594_v27 }
 0x5bd   : > { %1599 = vst.msk [vmem:[%s984_s18] sm:$0xf] %vm1598_vm8, %v1597_v28  ;;  %s2096_s18 = sshll.u32 %s2561_s0, 5 }
 0x5c0   : > { %v1679_v30 = vpop.f32.mrf.mxu0 }
 0x5c8   : > { %v1654_v29 = vpop.f32.mrf.mxu3 }
 0x5c9   : > { %v1680_v31 = vadd.f32 %v1679_v30, %v1654_v29 }
 0x5cb   : > { %2082 = vmatmul.msk.f32.vlgmr.msrb.gmra.mxu1 %vm1682_vm9, %v1680_v31 }
 0x648   : > { %v1707_v33 = vpop.f32.mrf.mxu1 }
 0x649   : > { %2083 = vmatpush.msk.msrb.mxu2 %vm1686_vm7, %v1707_v33 }
 0x64a   : > { %2084 = vmatmul.msk.f32.vlgmr.msrb.gmra.mxu2 %vm1682_vm9, %v1603_v32 }
 0x64b   : > { %2245 = shalt.err (!%p2242_p3)
}
 0x64c   : > { %s2378_s1 = smov 128   ;;  %s2918_s26 = sld [smem:[#allocation31_spill]] }
 0x64d   : > { %s2919_s3 = sld [smem:[#allocation33_spill]]  ;;  %s2379_s6 = smov 8  }
 0x64e   : > { %2101 = dma.vmem_to_hbm [thread:$0]  (%p2591_p10), %s1788_s11, 256, %s1790_s4, %s2792_s5, %s2378_s1, %s2378_s1, %s2379_s6  }
 0x64f   : > { %s2092_s28 = sshll.u32 %s2561_s0, 3  ;;  %s1740_s27 = scalar_lea.sflag [#allocation4], %s2621_s2 }
 0x652   : > { %s1769_s8 = scalar_lea.hbm %s2918_s26, %s2096_s18  ;;  %s2266_s14 = scalar_lea.hbm %s2918_s26, 192 }
 0x653   : > { %s1772_s9 = sshll.u32 %s1769_s8, 4  ;;  %s1802_s20 = scalar_lea.hbm %s2919_s3, %s2092_s28  ;;  %s1773_s9 = int_to_ptr.hbm [resolvable:$true] %s1772_s9 }
 0x654   : > { %s2260_s7 = sshra.s32 %s1773_s9, 4  ;;  %s2261_s7 = int_to_ptr.hbm [resolvable:$true] %s2260_s7 }
 0x655   : > { %s2262_s13 = scalar_lea.hbm %s2261_s7, 32  ;;  %p2267_p5 = scmp.lt.s32.totalorder %s2261_s7, %s2918_s26 }
 0x656   : > { %p2263_p4 = scmp.ne.s32.totalorder %s2261_s7, %s2262_s13  ;;  %p2268_p9 = scmp.lt.s32.totalorder %s2266_s14, %s2262_s13 }
 0x658   : > { %p2264_p7 = pnand %p2263_p4, %p2591_p10  ;;  %p2269_p6 = por %p2268_p9, %p2267_p5 }
 0x65a   : > { %p2265_p8 = pneg %p2264_p7 }
 0x65c   : > { %p2270_p11 = pnand %p2269_p6, %p2265_p8 }
 0x65e   : > { %2273 = shalt.err (!%p2270_p11)
}
 0x65f   : > { %2100 = dma.vmem_to_hbm [thread:$0]  (%p2591_p10), %s2786_s12, 512, %s1773_s9, %s1740_s27, %s2378_s1, %s2378_s1, %s2379_s6  }
 0x660   : > { %s1804_s8 = sshll.u32 %s2756_s10, 4  ;;  %s1806_s4 = sshll.u32 %s1802_s20, 4  ;;  %s1805_s8 = int_to_ptr.vmem [resolvable:$true] %s1804_s8  ;;  %s1807_s4 = int_to_ptr.hbm [resolvable:$true] %s1806_s4 }
 0x661   : > { %s2288_s0 = sshra.s32 %s1807_s4, 4  ;;  %s2294_s13 = scalar_lea.hbm %s2919_s3, 48  ;;  %s2289_s0 = int_to_ptr.hbm [resolvable:$true] %s2288_s0 }
 0x662   : > { %s2290_s2 = scalar_lea.hbm %s2289_s0, 8  ;;  %p2295_p1 = scmp.lt.s32.totalorder %s2289_s0, %s2919_s3 }
 0x663   : > { %p2291_p12 = scmp.ne.s32.totalorder %s2289_s0, %s2290_s2  ;;  %p2296_p2 = scmp.lt.s32.totalorder %s2294_s13, %s2290_s2 }
 0x665   : > { %p2292_p13 = pnand %p2291_p12, %p2591_p10  ;;  %p2297_p3 = por %p2296_p2, %p2295_p1 }
 0x667   : > { %p2293_p0 = pneg %p2292_p13 }
 0x669   : > { %p2298_p4 = pnand %p2297_p3, %p2293_p0 }
 0x66b   : > { %2301 = shalt.err (!%p2298_p4)
}
 0x66c   : > { %s2920_s9 = sld [smem:[#allocation35_spill]]  ;;  %s2036_s14 = sshll.u32 %s2778_s15, 1  ;;  %vm1737_vm10 = vcmask 9216  }
 0x66d   : > { %2102 = dma.vmem_to_hbm [thread:$0]  (%p2591_p10), %s1805_s8, 128, %s1807_s4, %s2792_s5  }
 0x672   : > { %s988_s6 = scalar_lea.vmem %s2920_s9, %s2036_s14 }
 0x6cd   : > { %v1733_v34 = vpop.f32.mrf.mxu2 }
 0x6ce   : > { %v1736_v35 = vsub.f32 %v2753_v18, %v1733_v34 }
 0x6d0   : > { %1738 = vst.msk [vmem:[%s988_s6] sm:$0x3] %vm1737_vm10, %v1736_v35 }
 0x6d1 PF: > { %s2921_s10 = sld [smem:[#allocation36_spill]]  ;;  %p2121_p7 = scmp.ge.s32.totalorder %s2344_s22, 2 }
 0x6d2   : > { %s2922_s7 = sld [smem:[#allocation41_spill]] }
 0x6d7   : > { %s1824_s11 = sand.u32 1, %s2921_s10  }
 0x6d8   : > { %p2923_p8 = scmp.ne.s32.totalorder %s2922_s7, 0  ;;  %s1825_s12 = scalar_lea.sflag [#allocation4], %s1824_s11 }
 0x6da   : > { %p2111_p5 = pnand %p2121_p7, %p2923_p8 }
 0x6dc   : > { %p2112_p9 = pneg %p2111_p5 }
 0x6de   : > { %2323 = dma.done.wait (%p2112_p9), %s1825_s12, 512  }
 0x6df   : > { %2325 = vsyncadd (%p2112_p9), %s1825_s12, 4294966784  ;;  %s2924_s5 = sadd.s32 4294967294, %s2344_s22  }
 0x6e0   : > { %s1834_s15 = sand.u32 1, %s2924_s5  }
 0x6e1   : > { %s1835_s23 = scalar_lea.sflag [#allocation7], %s1834_s15 }
 0x6e2   : > { %2327 = dma.done.wait (%p2112_p9), %s1835_s23, 384  }
 0x6e3   : > { %2329 = vsyncadd (%p2112_p9), %s1835_s23, 4294966912  ;;  %s2925_s22 = sld [smem:[#allocation38_spill]]  ;;  %s2928_s15 = smov %s2336_s16 }
 0x6e4   : > { %s2926_s18 = sld [smem:[#allocation37_spill]] }
 0x6e5   : > { %s2927_s1 = sld [smem:[#allocation39_spill]] }
 0x6e9   : > { %p78_p10 = scmp.ge.s32.totalorder %s2925_s22, 8  }
 0x6ea   : > { %s2929_s16 = smov %s2926_s18 }
 0x6eb   : > { %s2930_s18 = smov %s2927_s1  ;;  %80 = sbr.rel (!%p78_p10) target bundleno = 75 (0x4b), region = 255 }
 0x6f0   :  { %1865 = vsyncpa [#allocation3], 1 }
 0x6f1   :  { %1867 = vsyncpa [#allocation3 + $0x1], 1 }
 0x6f2   :  { %1868 = vsyncpa [#allocation4], 1 }
 0x6f3   :  { %1870 = vsyncpa [#allocation4 + $0x1], 1 }
 0x6f4   :  { %1871 = vsyncpa [#allocation7], 1 }
 0x6f5   :  { %1873 = vsyncpa [#allocation7 + $0x1], 1 }

</bundles_post_ra>
